<compile_context>
chip_gen: v7x
topology: tpu7x:2x2x1
jax: 0.10.0
libtpu: 0.0.40
codegen_flags: <defaults>
</compile_context>

<pallas_src>
import functools
import math

import jax
import jax.numpy as jnp
from jax.experimental import pallas as pl
from jax.experimental.pallas import tpu as pltpu


def _round_up(x, m):
    return ((x + m - 1) // m) * m


# --------------------------------------------------------------------------- #
# Activations (must be JAX-traceable; torch nn.Module activations have to be
# supplied as their jnp equivalents).
# --------------------------------------------------------------------------- #
def _fast_sigmoid(g):
    # sigmoid(g) = 1 / (1 + exp(-g)); the approximate reciprocal runs on the
    # EUP slot instead of a VPU divide chain in the serial epilogue.
    return pl.reciprocal(1.0 + jnp.exp(-g), approx=True)


def _exact_sigmoid(g):
    return 1.0 / (1.0 + jnp.exp(-g))


# --------------------------------------------------------------------------- #
# Kernel body
# --------------------------------------------------------------------------- #
def _glu_kernel(x_ref, w_ref, b_ref, o_ref, acc_ref, *, activation):
    """One (tm, tn) GLU output tile; fused (tm, 2*tn) matmul accumulated over K."""
    k = pl.program_id(2)

    x = x_ref[...]
    if x.dtype != w_ref.dtype:          # in-kernel cast -> bf16 MXU path,
        x = x.astype(w_ref.dtype)       # no extra HBM pass over x.
    prod = jnp.dot(x, w_ref[...], preferred_element_type=jnp.float32)

    @pl.when(k == 0)
    def _():
        # Fold the (f32) bias into the first accumulator write: saves one full
        # (tm, 2tn) zero-fill + read-add pass and keeps the bias add in f32.
        acc_ref[...] = prod + b_ref[...].astype(jnp.float32)

    @pl.when(k > 0)
    def _():
        acc_ref[...] += prod

    @pl.when(k == pl.num_programs(2) - 1)
    def _():
        tn = o_ref.shape[-1]            # lane-tile-aligned static split
        acc = acc_ref[...]
        v = acc[:, :tn]                 # value half
        g = acc[:, tn:]                 # gate half
        o_ref[...] = (v * activation(g)).astype(o_ref.dtype)


# --------------------------------------------------------------------------- #
# Tiling / weight-fusion helpers (run once, cached by PallasGLU)
# --------------------------------------------------------------------------- #
def _select_nk_tiles(dim_in, dim_out, tn, tk, max_single_n=1024):
    assert tn % 128 == 0, "tn must be a multiple of 128 (lane-aligned split)"
    assert tk % 128 == 0, "tk must be a multiple of 128"

    # N: collapse to a single N block when it fits -> weights stream exactly
    # once per M tile and x is never re-read.
    np_ = _round_up(dim_out, 128)
    if np_ <= max(tn, max_single_n):
        tn_e = np_
    else:
        tn_e = tn
        np_ = _round_up(dim_out, tn_e)

    # K: prefer a 128-aligned divisor of dim_in (no padding of x); otherwise
    # pad K to a multiple of tk.
    if dim_in <= tk:
        tk_e, kp = dim_in, dim_in
    else:
        tk_e = 0
        c = tk
        while c >= 128:
            if dim_in % c == 0:
                tk_e = c
                break
            c -= 128
        if tk_e:
            kp = dim_in
        else:
            tk_e = tk
            kp = _round_up(dim_in, tk_e)
    return tn_e, tk_e, np_, kp


def _fuse_weights(w, b, dim_out, tn_e, np_, kp, w_dtype):
    """Pack value/gate weight halves into one (Kp, 2*Np) stream; bias stays f32."""
    dim_in = w.shape[0]
    nb = np_ // tn_e
    if b is None:
        b = jnp.zeros((2 * dim_out,), dtype=jnp.float32)

    if nb == 1 and np_ == dim_out and kp == dim_in:
        w_fused = w                                   # already [wv | wg], no copy
        b_fused = b.reshape(1, 2 * dim_out)
    else:
        w_v = jnp.pad(w[:, :dim_out], ((0, kp - dim_in), (0, np_ - dim_out)))
        w_g = jnp.pad(w[:, dim_out:], ((0, kp - dim_in), (0, np_ - dim_out)))
        w_fused = jnp.concatenate(
            [w_v.reshape(kp, nb, tn_e), w_g.reshape(kp, nb, tn_e)], axis=-1
        ).reshape(kp, 2 * np_)
        b_v = jnp.pad(b[:dim_out], (0, np_ - dim_out))
        b_g = jnp.pad(b[dim_out:], (0, np_ - dim_out))
        b_fused = jnp.concatenate(
            [b_v.reshape(nb, tn_e), b_g.reshape(nb, tn_e)], axis=-1
        ).reshape(1, 2 * np_)

    return w_fused.astype(w_dtype), b_fused.astype(jnp.float32)


# --------------------------------------------------------------------------- #
# Forward call
# --------------------------------------------------------------------------- #
def _glu_call(x, w_fused, b_fused, dim_out, np_, kp, tn_e, tk_e, tm_target,
              activation, vmem_limit_bytes=None):
    orig_shape = x.shape
    dim_in = orig_shape[-1]
    out_dtype = x.dtype
    M = math.prod(orig_shape[:-1]) if len(orig_shape) > 1 else 1
    x2 = x.reshape(M, dim_in)

    # Pad K only when a 128-aligned divisor of dim_in was not available.
    if kp != dim_in:
        x2 = jnp.pad(x2, ((0, 0), (0, kp - dim_in)))

    # M tile: sublane-multiple for the narrowest participating dtype
    # (16 for bf16, 32 for 8-bit, 8 for f32).  No padding of x along M:
    # the ragged last M block is handled by Pallas masked DMA.
    min_item = min(jnp.dtype(x2.dtype).itemsize, jnp.dtype(w_fused.dtype).itemsize,
                   jnp.dtype(out_dtype).itemsize)
    m_mult = {4: 8, 2: 16, 1: 32}.get(min_item, 8)
    if M >= m_mult:
        tm_e = _round_up(min(tm_target, _round_up(M, m_mult)), m_mult)
    else:
        tm_e = M                       # block == full dim (allowed exception)

    grid = (pl.cdiv(M, tm_e), np_ // tn_e, kp // tk_e)

    # VMEM footprint: double-buffered streams + resident f32 accumulator.
    xb = tm_e * tk_e * jnp.dtype(x2.dtype).itemsize
    wb = tk_e * 2 * tn_e * jnp.dtype(w_fused.dtype).itemsize
    bb = 2 * tn_e * jnp.dtype(b_fused.dtype).itemsize
    ob = tm_e * tn_e * jnp.dtype(out_dtype).itemsize
    acc = tm_e * 2 * tn_e * 4
    needed = 2 * (xb + wb + bb + ob) + acc
    if vmem_limit_bytes is None:
        # 1.5x headroom for Mosaic internal scratch; never clamps below the
        # real footprint.  Defaults land at 32 MiB -> safe on v5e/v6e/v7x.
        vmem_limit_bytes = max(int(needed * 1.5), 32 * 1024 * 1024)

    out = pl.pallas_call(
        functools.partial(_glu_kernel, activation=activation),
        out_shape=jax.ShapeDtypeStruct((M, np_), out_dtype),
        grid_spec=pltpu.PrefetchScalarGridSpec(
            num_scalar_prefetch=0,
            grid=grid,
            in_specs=[
                pl.BlockSpec((tm_e, tk_e), lambda i, j, k: (i, k)),       # x
                pl.BlockSpec((tk_e, 2 * tn_e), lambda i, j, k: (k, j)),   # [wv|wg]
                pl.BlockSpec((1, 2 * tn_e), lambda i, j, k: (0, j)),      # [bv|bg] (f32)
            ],
            out_specs=pl.BlockSpec((tm_e, tn_e), lambda i, j, k: (i, j)),
            scratch_shapes=[pltpu.VMEM((tm_e, 2 * tn_e), jnp.float32)],
        ),
        compiler_params=pltpu.CompilerParams(
            dimension_semantics=("parallel", "parallel", "arbitrary"),
            vmem_limit_bytes=int(vmem_limit_bytes),
        ),
    )(x2, w_fused, b_fused)

    if np_ != dim_out:
        out = out[:, :dim_out]
    return out.reshape(*orig_shape[:-1], dim_out)


class PallasGLU:
    """GLU layer with cached fused weights (use this for repeated forward calls).

    w: (dim_in, 2*dim_out) projection weight (transposed vs torch nn.Linear).
    b: (2*dim_out,) bias or None.
    activation: JAX-traceable gate activation (default: fast in-kernel sigmoid).
    compute_dtype: matmul operand dtype (default bf16 -> MXU peak on v6e/v7x);
      None keeps the weight dtype (e.g. full f32 path).  Accumulation and bias
      add are always f32.
    """

    def __init__(self, w, b=None, dim_out=None, *, activation=None,
                 compute_dtype=jnp.bfloat16, tm=1024, tn=512, tk=1024,
                 vmem_limit_bytes=None):
        dim_in, two_out = w.shape
        if dim_out is None:
            dim_out = two_out // 2
        assert two_out == 2 * dim_out, "weight must have shape (dim_in, 2*dim_out)"

        self.dim_in, self.dim_out = dim_in, dim_out
        self.activation = activation if activation is not None else _fast_sigmoid
        self.tm_target = tm
        self.vmem_limit_bytes = vmem_limit_bytes

        self.tn_e, self.tk_e, self.np_, self.kp = _select_nk_tiles(dim_in, dim_out, tn, tk)
        w_dtype = jnp.dtype(compute_dtype) if compute_dtype is not None else w.dtype
        # Fuse + pad + cast once; per-call forward does no weight re-layout.
        self.w_fused, self.b_fused = _fuse_weights(
            w, b, dim_out, self.tn_e, self.np_, self.kp, w_dtype)

    def __call__(self, x):
        assert x.shape[-1] == self.dim_in
        return _glu_call(x, self.w_fused, self.b_fused, self.dim_out,
                         self.np_, self.kp, self.tn_e, self.tk_e,
                         self.tm_target, self.activation, self.vmem_limit_bytes)


def glu_forward(x, w, b=None, dim_out=None, **kwargs):
    """One-shot functional GLU forward.

    NOTE: re-fuses the weight layout on every call; for repeated use construct
    a PallasGLU once (weights are fused/cast once and cached).
    """
    return PallasGLU(w, b, dim_out, **kwargs)(x)


# --------------------------------------------------------------------------- #
# Reference + self-test
# --------------------------------------------------------------------------- #
def _reference_glu(x, w, b, dim_out):
    proj = jnp.dot(x.astype(jnp.float32), w.astype(jnp.float32),
                   precision=jax.lax.Precision.HIGHEST)
    if b is not None:
        proj = proj + b.astype(jnp.float32)
    v, g = proj[..., :dim_out], proj[..., dim_out:]
    return (v * jax.nn.sigmoid(g)).astype(x.dtype)


if __name__ == "__main__":
    # Small shapes implied by the module: a 3-D activation tensor (B, S, dim_in).
    batch, seq, dim_in, dim_out = 2, 8, 32, 32

    key = jax.random.PRNGKey(0)
    kx, kw, kb = jax.random.split(key, 3)

    x = jax.random.normal(kx, (batch, seq, dim_in), dtype=jnp.float32)

    # nn.Linear-style init U(-1/sqrt(dim_in), 1/sqrt(dim_in)); weight stored
    # transposed (dim_in, 2*dim_out) vs torch's (2*dim_out, dim_in).
    bound = 1.0 / (dim_in ** 0.5)
    w = jax.random.uniform(kw, (dim_in, 2 * dim_out), minval=-bound, maxval=bound,
                           dtype=jnp.float32)
    b = jax.random.uniform(kb, (2 * dim_out,), minval=-bound, maxval=bound,
                           dtype=jnp.float32)

    ref = _reference_glu(x, w, b, dim_out)

    # 1) Default fast path: bf16 MXU compute, f32 accumulation + f32 bias add,
    #    EUP-reciprocal sigmoid epilogue.  Weights fused & cast once.
    glu_fast = PallasGLU(w, b, dim_out)
    out_fast = jax.block_until_ready(glu_fast(x))
    assert out_fast.shape == (batch, seq, dim_out), out_fast.shape
    assert jnp.allclose(out_fast, ref, atol=3e-2, rtol=3e-2), "bf16 path mismatch"

    # 2) Full-precision path (no bf16 cast, exact sigmoid) for tight validation
    #    of the forward semantics.
    glu_f32 = PallasGLU(w, b, dim_out, compute_dtype=None, activation=_exact_sigmoid)
    out_f32 = jax.block_until_ready(glu_f32(x))
    assert out_f32.shape == (batch, seq, dim_out), out_f32.shape
    assert jnp.allclose(out_f32, ref, atol=5e-3, rtol=5e-3), "f32 path mismatch"

    print("KERNEL_OK")
</pallas_src>

<mosaic_0001>
module attributes {stable_mosaic.version = 11 : i64} {
  func.func @_glu_kernel(%arg0: i32, %arg1: i32, %arg2: i32, %arg3: memref<16x32xf32, #tpu.memory_space<vmem>>, %arg4: memref<32x256xbf16, #tpu.memory_space<vmem>>, %arg5: memref<1x256xf32, #tpu.memory_space<vmem>>, %arg6: memref<16x128xf32, #tpu.memory_space<vmem>>, %arg7: memref<16x256xf32, #tpu.memory_space<vmem>>) attributes {dimension_semantics = [#tpu.dimension_semantics<parallel>, #tpu.dimension_semantics<parallel>, #tpu.dimension_semantics<arbitrary>], iteration_bounds = array<i64: 1, 1, 1>, scalar_prefetch = 0 : i64, scratch_operands = 1 : i64, tpu.core_type = #tpu.core_type<tc>, window_params = [{transform_indices = @transform_0, window_bounds = array<i64: 16, 32>}, {transform_indices = @transform_1, window_bounds = array<i64: 32, 256>}, {transform_indices = @transform_2, window_bounds = array<i64: 1, 256>}, {transform_indices = @transform_3, window_bounds = array<i64: 16, 128>}]} {
    %c0 = arith.constant 0 : index
    %c0_0 = arith.constant 0 : index
    %0 = vector.load %arg3[%c0, %c0_0] : memref<16x32xf32, #tpu.memory_space<vmem>>, vector<16x32xf32>
    %1 = arith.truncf %0 : vector<16x32xf32> to vector<16x32xbf16>
    %c0_1 = arith.constant 0 : index
    %c0_2 = arith.constant 0 : index
    %2 = vector.load %arg4[%c0_1, %c0_2] : memref<32x256xbf16, #tpu.memory_space<vmem>>, vector<32x256xbf16>
    %cst = arith.constant dense<0.000000e+00> : vector<16x256xf32>
    %3 = tpu.matmul %1, %2, %cst {dimension_numbers = #tpu.dot_dimension_numbers<[1], [0], [0], [1], [0, 0, 1, 1], [], []>} : vector<16x32xbf16>, vector<32x256xbf16>, vector<16x256xf32> -> vector<16x256xf32>
    %c0_i32 = arith.constant 0 : i32
    %4 = arith.cmpi eq, %arg2, %c0_i32 : i32
    %5 = arith.extui %4 : i1 to i32
    %c0_i32_3 = arith.constant 0 : i32
    %6 = arith.cmpi ne, %5, %c0_i32_3 : i32
    scf.if %6 {
      %c0_8 = arith.constant 0 : index
      %c0_9 = arith.constant 0 : index
      %13 = vector.load %arg5[%c0_8, %c0_9] : memref<1x256xf32, #tpu.memory_space<vmem>>, vector<1x256xf32>
      %14 = vector.broadcast %13 : vector<1x256xf32> to vector<16x256xf32>
      %15 = arith.addf %3, %14 : vector<16x256xf32>
      %c0_10 = arith.constant 0 : index
      %c0_11 = arith.constant 0 : index
      %16 = vector.load %arg7[%c0_10, %c0_11] : memref<16x256xf32, #tpu.memory_space<vmem>>, vector<16x256xf32>
      tpu.vector_store %arg7[%c0_10, %c0_11], %15 {strides = array<i32>} : memref<16x256xf32, #tpu.memory_space<vmem>>, vector<16x256xf32>,
    } else {
    }
    %c0_i32_4 = arith.constant 0 : i32
    %7 = arith.cmpi sgt, %arg2, %c0_i32_4 : i32
    %8 = arith.extui %7 : i1 to i32
    %c0_i32_5 = arith.constant 0 : i32
    %9 = arith.cmpi ne, %8, %c0_i32_5 : i32
    scf.if %9 {
      %c0_8 = arith.constant 0 : index
      %c0_9 = arith.constant 0 : index
      %13 = vector.load %arg7[%c0_8, %c0_9] : memref<16x256xf32, #tpu.memory_space<vmem>>, vector<16x256xf32>
      %14 = arith.addf %13, %3 : vector<16x256xf32>
      %c0_10 = arith.constant 0 : index
      %c0_11 = arith.constant 0 : index
      %15 = vector.load %arg7[%c0_10, %c0_11] : memref<16x256xf32, #tpu.memory_space<vmem>>, vector<16x256xf32>
      tpu.vector_store %arg7[%c0_10, %c0_11], %14 {strides = array<i32>} : memref<16x256xf32, #tpu.memory_space<vmem>>, vector<16x256xf32>,
    } else {
    }
    %c0_i32_6 = arith.constant 0 : i32
    %10 = arith.cmpi eq, %arg2, %c0_i32_6 : i32
    %11 = arith.extui %10 : i1 to i32
    %c0_i32_7 = arith.constant 0 : i32
    %12 = arith.cmpi ne, %11, %c0_i32_7 : i32
    scf.if %12 {
      %c0_8 = arith.constant 0 : index
      %c0_9 = arith.constant 0 : index
      %13 = vector.load %arg7[%c0_8, %c0_9] : memref<16x256xf32, #tpu.memory_space<vmem>>, vector<16x256xf32>
      %14 = vector.extract_strided_slice %13 {offsets = [0, 0], sizes = [16, 128], strides = [1, 1]} : vector<16x256xf32> to vector<16x128xf32>
      %15 = vector.extract_strided_slice %13 {offsets = [0, 128], sizes = [16, 128], strides = [1, 1]} : vector<16x256xf32> to vector<16x128xf32>
      %cst_10 = arith.constant 0.000000e+00 : f32
      %16 = vector.broadcast %cst_10 : f32 to vector<16x128xf32>
      %17 = arith.subf %16, %15 : vector<16x128xf32>
      %18 = math.exp %17 : vector<16x128xf32>
      %cst_11 = arith.constant 1.000000e+00 : f32
      %19 = vector.broadcast %cst_11 : f32 to vector<16x128xf32>
      %20 = arith.addf %19, %18 : vector<16x128xf32>
      %21 = tpu.reciprocal %20 {approx = true} : vector<16x128xf32> -> vector<16x128xf32>
      %22 = arith.mulf %14, %21 : vector<16x128xf32>
      %c0_12 = arith.constant 0 : index
      %c0_13 = arith.constant 0 : index
      %23 = vector.load %arg6[%c0_12, %c0_13] : memref<16x128xf32, #tpu.memory_space<vmem>>, vector<16x128xf32>
      tpu.vector_store %arg6[%c0_12, %c0_13], %22 {strides = array<i32>} : memref<16x128xf32, #tpu.memory_space<vmem>>, vector<16x128xf32>,
    } else {
    }
    return
  }
  func.func @transform_0(%arg0: i32, %arg1: i32, %arg2: i32) -> (i32, i32) {
    %c0_i32 = arith.constant 0 : i32
    return %arg0, %arg2 : i32, i32
  }
  func.func @transform_1(%arg0: i32, %arg1: i32, %arg2: i32) -> (i32, i32) {
    %c0_i32 = arith.constant 0 : i32
    return %arg2, %arg1 : i32, i32
  }
  func.func @transform_2(%arg0: i32, %arg1: i32, %arg2: i32) -> (i32, i32) {
    %c0_i32 = arith.constant 0 : i32
    %c0_i32_0 = arith.constant 0 : i32
    return %c0_i32, %arg1 : i32, i32
  }
  func.func @transform_3(%arg0: i32, %arg1: i32, %arg2: i32) -> (i32, i32) {
    %c0_i32 = arith.constant 0 : i32
    return %arg0, %arg1 : i32, i32
  }
}

</mosaic_0001>

<bundles_post_ra>
// kernel: tpu_custom_call.1
= control target key start
LH: loop header
LB: loop body
LE: loop exit
PB: predicated region body
PF: predicated region fallthrough
CT: control target
= control target key end

     0   :  { %8 = vsyncpa [#allocation4], 0  ;;  %s368_s0 = inlined_call_operand.hbm [shape: f32[16,32], index: 0, kind: input, shape index: {}]   ;;  %s369_s1 = inlined_call_operand.hbm [shape: bf16[32,256], index: 1, kind: input, shape index: {}]   ;;  %s370_s2 = inlined_call_operand.vmem [shape: f32[1,256], index: 2, kind: input, shape index: {}]   ;;  %s371_s3 = inlined_call_operand.hbm [shape: f32[16,128], index: 3, kind: output, shape index: {}]  }
   0x1   :  { %9 = vsyncpa [#allocation7], 0 }
   0x2   :  { %10 = vsyncpa [#allocation5], 0  ;;  %s294_s12 = smov [#allocation3]   ;;  %s222_s16 = scalar_lea.hbm %s368_s0, 256 }
   0x3   :  { %s16_s13 = sshll.u32 %s294_s12, 4  ;;  %p223_p0 = scmp.ne.s32.totalorder %s368_s0, %s222_s16  ;;  %s17_s13 = int_to_ptr.vmem [resolvable:$true] %s16_s13 }
   0x4   :  { %p226_p1 = scmp.lt.u32.totalorder %s222_s16, %s368_s0 }
   0x6   :  { %p228_p2 = pnand %p226_p1, %p223_p0 }
   0x8   :  { %231 = shalt.err (!%p228_p2)
}
   0x9   :  { %s232_s21 = scalar_lea.vmem %s17_s13, 256  ;;  %p237_p4 = scmp.lt.s32.totalorder %s17_s13, %s17_s13 }
   0xa   :  { %p233_p3 = scmp.ne.s32.totalorder %s17_s13, %s232_s21  ;;  %p238_p5 = scmp.lt.s32.totalorder %s232_s21, %s232_s21 }
   0xc   :  { %p239_p6 = por %p238_p5, %p237_p4 }
   0xe   :  { %p240_p7 = pnand %p239_p6, %p233_p3 }
  0x10   :  { %243 = shalt.err (!%p240_p7)
}
  0x11   :  { %s295_s22 = smov 128   ;;  %s296_s23 = smov 8  }
  0x12   :  { %22 = dma.hbm_to_vmem [thread:$0]  %s368_s0, 256, %s17_s13, [#allocation4], %s295_s22, %s295_s22, %s296_s23  }
  0x13   :  { %s297_s26 = smov [#allocation6]   ;;  %s244_s30 = scalar_lea.hbm %s369_s1, 512 }
  0x14   :  { %s28_s27 = sshll.u32 %s297_s26, 4  ;;  %p245_p8 = scmp.ne.s32.totalorder %s369_s1, %s244_s30  ;;  %s29_s27 = int_to_ptr.vmem [resolvable:$true] %s28_s27 }
  0x15   :  { %p248_p9 = scmp.lt.u32.totalorder %s244_s30, %s369_s1 }
  0x17   :  { %p250_p10 = pnand %p248_p9, %p245_p8 }
  0x19   :  { %253 = shalt.err (!%p250_p10)
}
  0x1a   :  { %s254_s8 = scalar_lea.vmem %s29_s27, 512  ;;  %p259_p12 = scmp.lt.s32.totalorder %s29_s27, %s29_s27 }
  0x1b   :  { %p255_p11 = scmp.ne.s32.totalorder %s29_s27, %s254_s8  ;;  %p260_p13 = scmp.lt.s32.totalorder %s254_s8, %s254_s8 }
  0x1d   :  { %p261_p0 = por %p260_p13, %p259_p12 }
  0x1f   :  { %p262_p1 = pnand %p261_p0, %p255_p11 }
  0x21   :  { %265 = shalt.err (!%p262_p1)
}
  0x22   :  { %34 = dma.hbm_to_vmem [thread:$0]  %s369_s1, 512, %s29_s27, [#allocation7], %s295_s22, %s295_s22, %s296_s23  }
  0x23   :  { %288 = dma.done.wait [#allocation4], 256  }
  0x24   :  { %289 = vsyncadd [#allocation4], 4294967040 }
  0x25   :  { %290 = dma.done.wait [#allocation7], 512  }
  0x26   :  { %291 = vsyncadd [#allocation7], 4294966784  ;;  %v298_v0 = vmov 0   ;;  %v208_v1 = vld [vmem:[#allocation6 + $0x4] ss:$8 sps:$4 sm:$0xff]   ;;  %v44_v5 = vld [vmem:[#allocation3] sm:$0xff]  ;;  %v124_v8 = vlaneseq }
  0x27   :  { %107 = vmatprep.mubr.bf16.mxu0 %v298_v0  ;;  %v210_v2 = vld [vmem:[#allocation6] ss:$8 sps:$4 sm:$0xff]   ;;  %75 = vmatprep.subr.bf16.mxu0 %v208_v1  ;;  %v211_v3 = vld [vmem:[#allocation6 + $0x14] ss:$8 sps:$4 sm:$0xff]   ;;  %v213_v4 = vld [vmem:[#allocation6 + $0x10] ss:$8 sps:$4 sm:$0xff]  }
  0x28   :  { %76 = vmatpush1.bf16.msra.mxu0 %v210_v2  ;;  %v45_v6 = vld [vmem:[#allocation3 + $0x8] sm:$0xff]  ;;  %vm71_vm0 = vcmask 261120   ;;  %v125_v9 = vshrl.u32 %v124_v8, 7  ;;  %v122_v11 = vld [vmem:[%s370_s2] sm:$0x3]  ;;  %s299_s2 = smov [#allocation8]  }
  0x29   :  { %77 = vmatprep.subr.bf16.mxu0 %v211_v3  ;;  %v46_v7 = vpack.c.bf16 %v45_v6, %v44_v5  ;;  %s184_s11 = sshll.u32 %s299_s2, 4  ;;  %s185_s11 = int_to_ptr.vmem [resolvable:$true] %s184_s11 }
  0x2a   :  { %v130_v10 = vsub.s32 1, %v125_v9  ;;  %v126_v27 = vsub.s32 0, %v125_v9  ;;  %s266_s12 = scalar_lea.vmem %s185_s11, 256  ;;  %p271_p3 = scmp.lt.s32.totalorder %s185_s11, %s185_s11 }
  0x2b   :  { %p267_p2 = scmp.ne.s32.totalorder %s185_s11, %s266_s12  ;;  %p272_p4 = scmp.lt.s32.totalorder %s266_s12, %s266_s12 }
  0x2c   :  { %78 = vmatpush1.bf16.msra.mxu0 %v213_v4  ;;  %v131_v12 = vrot.slane %v122_v11, %v130_v10  ;;  %v127_v28 = vrot.slane %v122_v11, %v126_v27 }
  0x2d   :  { %p273_p5 = por %p272_p4, %p271_p3 }
  0x2f   :  { %201 = vmatmul.mubr.msk.bf16.vlgmr.msra.gmra.mrb[0].mxu0 %vm71_vm0, %v46_v7  ;;  %p274_p6 = pnand %p273_p5, %p267_p2 }
 0x102   :  { %v109_v13 = vpop.f32.mrb[0].mxu0 }
 0x103   :  { %v111_v14 = vpop.f32.mrb[1].mxu0  ;;  %v134_v29 = vadd.f32 %v127_v28, %v109_v13 }
 0x104   :  { %v135_v15 = vadd.f32 %v131_v12, %v111_v14  ;;  %v113_v16 = vpop.f32.mrb[2].mxu0 }
 0x105   :  { %v115_v17 = vpop.f32.mrb[3].mxu0  ;;  %v136_v31 = vadd.f32 %v127_v28, %v113_v16 }
 0x106   :  { %v165_v18 = vsub.f32 0.0, %v135_v15  ;;  %v137_v19 = vadd.f32 %v131_v12, %v115_v17 }
 0x108   :  { %v167_v20 = vmul.f32 1.442695, %v165_v18  ;;  %v166_v21 = vsub.f32 0.0, %v137_v19 }
 0x10a   :  { %214 = vpow2.f32 %v167_v20  ;;  %v169_v22 = vmul.f32 1.442695, %v166_v21 }
 0x10c   :  { %216 = vpow2.f32 %v169_v22 }
 0x114   :  { %v215_v23 = vpop.eup %214 }
 0x115   :  { %v171_v24 = vadd.f32 1.0, %v215_v23 }
 0x116   :  { %v217_v25 = vpop.eup %216 }
 0x117   :  { %218 = vrcp.f32 %v171_v24  ;;  %v172_v26 = vadd.f32 1.0, %v217_v25 }
 0x119   :  { %220 = vrcp.f32 %v172_v26 }
 0x121   :  { %v219_v30 = vpop.eup %218 }
 0x122   :  { %v175_v32 = vmul.f32 %v219_v30, %v134_v29 }
 0x123   :  { %v221_v33 = vpop.eup %220 }
 0x124   :  { %v176_v34 = vmul.f32 %v221_v33, %v136_v31  ;;  %177 = vst [vmem:[#allocation8] sm:$0xff] %v175_v32 }
 0x126   :  { %178 = vst [vmem:[#allocation8 + $0x8] sm:$0xff] %v176_v34 }
 0x127   :  { %277 = shalt.err (!%p274_p6)
}
 0x128   :  { %s278_s15 = scalar_lea.hbm %s371_s3, 256 }
 0x129   :  { %p279_p7 = scmp.ne.s32.totalorder %s371_s3, %s278_s15  ;;  %p282_p8 = scmp.lt.u32.totalorder %s278_s15, %s371_s3 }
 0x12b   :  { %p284_p9 = pnand %p282_p8, %p279_p7 }
 0x12d   :  { %287 = shalt.err (!%p284_p9)
}
 0x12e   :  { %190 = dma.vmem_to_hbm [thread:$0]  %s185_s11, 256, %s371_s3, [#allocation5], %s295_s22, %s295_s22, %s296_s23  }
 0x12f   :  { %292 = dma.done.wait [#allocation5], 256  }
 0x130   :  { %293 = vsyncadd [#allocation5], 4294967040 }
 0x131   :  { %194 = vsyncpa [#allocation4], 1 }
 0x132   :  { %195 = vsyncpa [#allocation7], 1 }
 0x133   :  { %196 = vsyncpa [#allocation5], 1 }

</bundles_post_ra>
